<compile_context>
chip_gen: v5e
topology: v5e:2x2
jax: 0.10.0
libtpu: 0.0.40
codegen_flags: <defaults>
</compile_context>

<pallas_src>
import functools

import jax
import jax.numpy as jnp
from jax.experimental import pallas as pl
from jax.experimental.pallas import tpu as pltpu


def _round_up(x: int, m: int) -> int:
    return ((x + m - 1) // m) * m


def _fast_recip(x):
    """EUP approximate reciprocal + two Newton-Raphson steps.

    The refinement runs only on the (TB, 1) row-sum columns, so the wide
    (TB, C) path stays divide-free (multiplies only) while the reciprocal
    itself lands in the otherwise mostly idle EUP slot. Two NR steps keep
    full f32 accuracy regardless of the hardware approximation precision.
    """
    r = pl.reciprocal(x, approx=True)
    r = r * (2.0 - x * r)
    r = r * (2.0 - x * r)
    return r


def _elr_kernel(ema_ref, logits_ref, ema_new_ref, reg_ref, *, beta, n_cls):
    # All compute in f32 regardless of the I/O dtype.
    logits = logits_ref[...].astype(jnp.float32)          # (TB, Cp)
    ema_old = ema_ref[...].astype(jnp.float32)            # (TB, Cp)

    c_pad = logits.shape[1]
    if c_pad != n_cls:
        # Class axis was padded up to a lane multiple: mask padded columns.
        col = jax.lax.broadcasted_iota(jnp.int32, logits.shape, 1)
        col_mask = col < n_cls
        logits = jnp.where(col_mask, logits, jnp.float32(-1e30))
        ema_old = jnp.where(col_mask, ema_old, 0.0)
    else:
        col_mask = None

    # softmax over the class axis (last dim = lanes)
    m = jnp.max(logits, axis=1, keepdims=True)
    e = jnp.exp(logits - m)
    y_pred = e * _fast_recip(jnp.sum(e, axis=1, keepdims=True))

    # torch.clamp(y_pred, 1e-4, 1 - 1e-4)
    y_pred = jnp.clip(y_pred, 0.0001, 1.0 - 0.0001)
    if col_mask is not None:
        y_pred = jnp.where(col_mask, y_pred, 0.0)          # undo clamp on pad lanes

    # detached, renormalized prediction used for the EMA update
    # TODO(synk): if a custom_vjp/backward is added, wrap y_norm in stop_gradient
    # to match y_pred_.detach() in the PyTorch reference.
    y_norm = y_pred * _fast_recip(jnp.sum(y_pred, axis=1, keepdims=True))

    # EMA update: ema <- beta * ema + (1 - beta) * y_norm
    ema_new = beta * ema_old + (1.0 - beta) * y_norm
    ema_new_ref[...] = ema_new.astype(ema_new_ref.dtype)

    # per-row regulariser term: log(1 - <ema_new, y_pred>)
    inner = jnp.sum(ema_new * y_pred, axis=1, keepdims=True)  # (TB, 1)
    reg_ref[...] = jnp.log(1.0 - inner)


def elr_loss_forward(ema, index, outputs, *, beta, lamb,
                     vmem_tile_budget=24 * 1024 * 1024):
    """Functional ELR_loss.forward (record_flag=False, `targets` unused by the
    reference). Returns (final_loss, updated_ema)."""
    B, C = outputs.shape
    out_dtype = ema.dtype

    # Gather of the EMA rows stays in plain JAX (XLA dynamic-gather).
    # Fusing it into the kernel would force (1, C) row blocks — one grid step
    # per sample — whose ~0.35 us/step overhead and per-row DMAs cost more than
    # the HBM round trips they save at classification-sized C.
    ema_rows = ema[index]                                   # (B, C)

    # Lane-dense class axis: pad C to a multiple of 128 only when it does not
    # meaningfully inflate HBM traffic (this kernel is memory-bound, so e.g.
    # padding C=32 -> 128 would quadruple the bytes moved for a store-side win).
    c128 = _round_up(C, 128)
    C_pad = c128 if (c128 == C or c128 <= C * 1.25) else C

    # Row tile: largest multiple of 8 such that 3 arrays x 2 pipeline buffers of
    # (TB, C_pad) f32 fit the VMEM budget, capped at 1024 rows (v7x-safe).
    row_bytes = C_pad * 4
    cap = max(8, min(1024, (vmem_tile_budget // (6 * row_bytes)) // 8 * 8))
    if B <= cap:
        TB = _round_up(B, 8)
        num_tiles = 1
    else:
        num_tiles = pl.cdiv(B, cap)
        TB = _round_up(pl.cdiv(B, num_tiles), 8)
    B_pad = TB * num_tiles

    def _pad(x):
        if B_pad == B and C_pad == C:
            return x
        return jnp.pad(x, ((0, B_pad - B), (0, C_pad - C)))

    ema_rows_p = _pad(ema_rows)
    logits_p = _pad(outputs)

    kernel = functools.partial(_elr_kernel, beta=float(beta), n_cls=C)

    ema_new_p, reg = pl.pallas_call(
        kernel,
        out_shape=(
            jax.ShapeDtypeStruct((B_pad, C_pad), out_dtype),
            jax.ShapeDtypeStruct((B_pad, 1), jnp.float32),
        ),
        grid_spec=pltpu.PrefetchScalarGridSpec(
            num_scalar_prefetch=0,
            grid=(num_tiles,),
            in_specs=[
                pl.BlockSpec((TB, C_pad), lambda i: (i, 0)),   # ema rows
                pl.BlockSpec((TB, C_pad), lambda i: (i, 0)),   # logits
            ],
            out_specs=[
                pl.BlockSpec((TB, C_pad), lambda i: (i, 0)),   # updated ema rows
                pl.BlockSpec((TB, 1), lambda i: (i, 0)),       # per-row log(1-inner)
            ],
        ),
        # The gathered EMA rows are a fresh intermediate inside the jit, so
        # donating them as the updated-EMA output buffer is free and removes a
        # separate (B_pad, C_pad) HBM allocation (P8). Blocks are fully
        # overwritten per tile and tiles are disjoint, so this is safe together
        # with the "parallel" grid axis.
        input_output_aliases={0: 0},
        compiler_params=pltpu.CompilerParams(
            # Tiles are fully independent (per-row reg output, disjoint ema
            # blocks) -> safe to shard across both TCs on v7x; no-op on v5e/v6e.
            dimension_semantics=("parallel",),
            vmem_limit_bytes=32 * 1024 * 1024,
        ),
    )(ema_rows_p, logits_p)

    ema_new_rows = ema_new_p[:B, :C]
    final_loss = lamb * jnp.mean(reg[:B, 0])

    # Scatter back (plain JAX). Duplicate indices: last-write-wins, matching the
    # (nondeterministic) in-place indexed assignment in PyTorch closely enough.
    ema_updated = ema.at[index].set(ema_new_rows)
    return final_loss, ema_updated


def _reference(ema, index, outputs, beta, lamb):
    y = jax.nn.softmax(outputs.astype(jnp.float32), axis=1)
    y = jnp.clip(y, 0.0001, 1.0 - 0.0001)
    y_norm = y / jnp.sum(y, axis=1, keepdims=True)
    ema_new = beta * ema[index] + (1.0 - beta) * y_norm
    reg = jnp.mean(jnp.log(1.0 - jnp.sum(ema_new * y, axis=1)))
    return lamb * reg, ema.at[index].set(ema_new)


if __name__ == "__main__":
    beta, lamb = 0.7, 3.0
    num_samples, num_cls, batch = 64, 32, 16

    key = jax.random.PRNGKey(0)
    k_ema, k_out, k_idx = jax.random.split(key, 3)

    # Deterministic non-zero EMA state (module initializes zeros; a normalized
    # positive table exercises the EMA-update path).
    ema = jax.nn.softmax(
        jax.random.normal(k_ema, (num_samples, num_cls)), axis=1).astype(jnp.float32)
    outputs = jax.random.normal(k_out, (batch, num_cls), dtype=jnp.float32)
    index = jax.random.permutation(k_idx, num_samples)[:batch]

    # 1) Default path (single tile, no padding).
    fwd = jax.jit(functools.partial(elr_loss_forward, beta=beta, lamb=lamb))
    loss, ema_new = jax.block_until_ready(fwd(ema, index, outputs))
    ref_loss, ref_ema = _reference(ema, index, outputs, beta, lamb)
    assert jnp.allclose(loss, ref_loss, atol=1e-5, rtol=1e-5), (loss, ref_loss)
    assert jnp.allclose(ema_new, ref_ema, atol=1e-5, rtol=1e-5)

    # 2) Multi-tile grid with a padded last row tile (tiny budget -> TB=8, 2 tiles).
    fwd_tiled = jax.jit(functools.partial(
        elr_loss_forward, beta=beta, lamb=lamb, vmem_tile_budget=1))
    b2 = 13
    loss2, ema_new2 = jax.block_until_ready(fwd_tiled(ema, index[:b2], outputs[:b2]))
    ref_loss2, ref_ema2 = _reference(ema, index[:b2], outputs[:b2], beta, lamb)
    assert jnp.allclose(loss2, ref_loss2, atol=1e-5, rtol=1e-5), (loss2, ref_loss2)
    assert jnp.allclose(ema_new2, ref_ema2, atol=1e-5, rtol=1e-5)

    # 3) Lane-padded class axis (C=250 -> padded to 256 inside the wrapper).
    num_cls3 = 250
    k_ema3, k_out3 = jax.random.split(jax.random.PRNGKey(1))
    ema3 = jax.nn.softmax(
        jax.random.normal(k_ema3, (num_samples, num_cls3)), axis=1).astype(jnp.float32)
    outputs3 = jax.random.normal(k_out3, (batch, num_cls3), dtype=jnp.float32)
    loss3, ema_new3 = jax.block_until_ready(fwd(ema3, index, outputs3))
    ref_loss3, ref_ema3 = _reference(ema3, index, outputs3, beta, lamb)
    assert jnp.allclose(loss3, ref_loss3, atol=1e-5, rtol=1e-5), (loss3, ref_loss3)
    assert jnp.allclose(ema_new3, ref_ema3, atol=1e-5, rtol=1e-5)

    print("KERNEL_OK")
</pallas_src>

<mosaic_0001>
module attributes {stable_mosaic.version = 11 : i64} {
  func.func @_elr_kernel(%arg0: i32, %arg1: memref<16x32xf32, #tpu.memory_space<vmem>>, %arg2: memref<16x32xf32, #tpu.memory_space<vmem>>, %arg3: memref<16x32xf32, #tpu.memory_space<vmem>>, %arg4: memref<16x1xf32, #tpu.memory_space<vmem>>) attributes {dimension_semantics = [#tpu.dimension_semantics<parallel>], iteration_bounds = array<i64: 1>, scalar_prefetch = 0 : i64, scratch_operands = 0 : i64, tpu.core_type = #tpu.core_type<tc>, window_params = [{transform_indices = @transform_0, window_bounds = array<i64: 16, 32>}, {transform_indices = @transform_1, window_bounds = array<i64: 16, 32>}, {transform_indices = @transform_2, window_bounds = array<i64: 16, 32>}, {transform_indices = @transform_3, window_bounds = array<i64: 16, 1>}]} {
    %c0 = arith.constant 0 : index
    %c0_0 = arith.constant 0 : index
    %0 = vector.load %arg2[%c0, %c0_0] : memref<16x32xf32, #tpu.memory_space<vmem>>, vector<16x32xf32>
    %c0_1 = arith.constant 0 : index
    %c0_2 = arith.constant 0 : index
    %1 = vector.load %arg1[%c0_1, %c0_2] : memref<16x32xf32, #tpu.memory_space<vmem>>, vector<16x32xf32>
    %cst = arith.constant dense<0xFF800000> : vector<16xf32>
    %2 = vector.multi_reduction <maximumf>, %0, %cst [1] : vector<16x32xf32> to vector<16xf32>
    %3 = vector.shape_cast %2 : vector<16xf32> to vector<16x1xf32>
    %4 = vector.broadcast %3 : vector<16x1xf32> to vector<16x32xf32>
    %5 = arith.subf %0, %4 : vector<16x32xf32>
    %6 = math.exp %5 : vector<16x32xf32>
    %cst_3 = arith.constant dense<0.000000e+00> : vector<16xf32>
    %7 = vector.multi_reduction <add>, %6, %cst_3 [1] : vector<16x32xf32> to vector<16xf32>
    %8 = vector.shape_cast %7 : vector<16xf32> to vector<16x1xf32>
    %9 = tpu.reciprocal %8 {approx = true} : vector<16x1xf32> -> vector<16x1xf32>
    %10 = arith.mulf %8, %9 : vector<16x1xf32>
    %cst_4 = arith.constant 2.000000e+00 : f32
    %11 = vector.broadcast %cst_4 : f32 to vector<16x1xf32>
    %12 = arith.subf %11, %10 : vector<16x1xf32>
    %13 = arith.mulf %9, %12 : vector<16x1xf32>
    %14 = arith.mulf %8, %13 : vector<16x1xf32>
    %cst_5 = arith.constant 2.000000e+00 : f32
    %15 = vector.broadcast %cst_5 : f32 to vector<16x1xf32>
    %16 = arith.subf %15, %14 : vector<16x1xf32>
    %17 = arith.mulf %13, %16 : vector<16x1xf32>
    %18 = vector.broadcast %17 : vector<16x1xf32> to vector<16x32xf32>
    %19 = arith.mulf %6, %18 : vector<16x32xf32>
    %cst_6 = arith.constant 9.99999974E-5 : f32
    %cst_7 = arith.constant 0.999899983 : f32
    %20 = vector.broadcast %cst_6 : f32 to vector<16x32xf32>
    %21 = arith.maximumf %20, %19 : vector<16x32xf32>
    %22 = vector.broadcast %cst_7 : f32 to vector<16x32xf32>
    %23 = arith.minimumf %22, %21 : vector<16x32xf32>
    %cst_8 = arith.constant dense<0.000000e+00> : vector<16xf32>
    %24 = vector.multi_reduction <add>, %23, %cst_8 [1] : vector<16x32xf32> to vector<16xf32>
    %25 = vector.shape_cast %24 : vector<16xf32> to vector<16x1xf32>
    %26 = tpu.reciprocal %25 {approx = true} : vector<16x1xf32> -> vector<16x1xf32>
    %27 = arith.mulf %25, %26 : vector<16x1xf32>
    %cst_9 = arith.constant 2.000000e+00 : f32
    %28 = vector.broadcast %cst_9 : f32 to vector<16x1xf32>
    %29 = arith.subf %28, %27 : vector<16x1xf32>
    %30 = arith.mulf %26, %29 : vector<16x1xf32>
    %31 = arith.mulf %25, %30 : vector<16x1xf32>
    %cst_10 = arith.constant 2.000000e+00 : f32
    %32 = vector.broadcast %cst_10 : f32 to vector<16x1xf32>
    %33 = arith.subf %32, %31 : vector<16x1xf32>
    %34 = arith.mulf %30, %33 : vector<16x1xf32>
    %35 = vector.broadcast %34 : vector<16x1xf32> to vector<16x32xf32>
    %36 = arith.mulf %23, %35 : vector<16x32xf32>
    %cst_11 = arith.constant 0.699999988 : f32
    %37 = vector.broadcast %cst_11 : f32 to vector<16x32xf32>
    %38 = arith.mulf %37, %1 : vector<16x32xf32>
    %cst_12 = arith.constant 3.000000e-01 : f32
    %39 = vector.broadcast %cst_12 : f32 to vector<16x32xf32>
    %40 = arith.mulf %39, %36 : vector<16x32xf32>
    %41 = arith.addf %38, %40 : vector<16x32xf32>
    %c0_13 = arith.constant 0 : index
    %c0_14 = arith.constant 0 : index
    %42 = vector.load %arg3[%c0_13, %c0_14] : memref<16x32xf32, #tpu.memory_space<vmem>>, vector<16x32xf32>
    tpu.vector_store %arg3[%c0_13, %c0_14], %41 {strides = array<i32>} : memref<16x32xf32, #tpu.memory_space<vmem>>, vector<16x32xf32>,
    %43 = arith.mulf %41, %23 : vector<16x32xf32>
    %cst_15 = arith.constant dense<0.000000e+00> : vector<16xf32>
    %44 = vector.multi_reduction <add>, %43, %cst_15 [1] : vector<16x32xf32> to vector<16xf32>
    %45 = vector.shape_cast %44 : vector<16xf32> to vector<16x1xf32>
    %cst_16 = arith.constant 1.000000e+00 : f32
    %46 = vector.broadcast %cst_16 : f32 to vector<16x1xf32>
    %47 = arith.subf %46, %45 : vector<16x1xf32>
    %48 = math.log %47 : vector<16x1xf32>
    %c0_17 = arith.constant 0 : index
    %c0_18 = arith.constant 0 : index
    %49 = vector.load %arg4[%c0_17, %c0_18] : memref<16x1xf32, #tpu.memory_space<vmem>>, vector<16x1xf32>
    tpu.vector_store %arg4[%c0_17, %c0_18], %48 {strides = array<i32>} : memref<16x1xf32, #tpu.memory_space<vmem>>, vector<16x1xf32>,
    return
  }
  func.func @transform_0(%arg0: i32) -> (i32, i32) {
    %c0_i32 = arith.constant 0 : i32
    %c0_i32_0 = arith.constant 0 : i32
    return %arg0, %c0_i32 : i32, i32
  }
  func.func @transform_1(%arg0: i32) -> (i32, i32) {
    %c0_i32 = arith.constant 0 : i32
    %c0_i32_0 = arith.constant 0 : i32
    return %arg0, %c0_i32 : i32, i32
  }
  func.func @transform_2(%arg0: i32) -> (i32, i32) {
    %c0_i32 = arith.constant 0 : i32
    %c0_i32_0 = arith.constant 0 : i32
    return %arg0, %c0_i32 : i32, i32
  }
  func.func @transform_3(%arg0: i32) -> (i32, i32) {
    %c0_i32 = arith.constant 0 : i32
    %c0_i32_0 = arith.constant 0 : i32
    return %arg0, %c0_i32 : i32, i32
  }
}

</mosaic_0001>

<bundles_post_ra>
// kernel: elr_loss_forward.1
= control target key start
LH: loop header
LB: loop body
LE: loop exit
PB: predicated region body
PF: predicated region fallthrough
CT: control target
= control target key end

     0   :  { %vm17_vm0 = vcmask 261120   ;;  %vm100_vm1 = vcmask 7168   ;;  %s181_s1 = inlined_call_operand.vmem [shape: f32[16,32], index: 1, kind: input, shape index: {}]   ;;  %s182_s0 = inlined_call_operand.vmem [shape: f32[16,32], index: 0, kind: input, shape index: {}, may-alias: {0,2}]   ;;  %s183_s2 = inlined_call_operand.vmem [shape: f32[16,32], index: 2, kind: output, shape index: {0}, may-alias: {0,2}]   ;;  %s184_s3 = inlined_call_operand.vmem [shape: f32[16,1], index: 3, kind: output, shape index: {1}]  }
   0x1   :  { %v13_v0 = vld [vmem:[%s181_s1] sm:$0xff]  ;;  %v14_v2 = vld [vmem:[%s181_s1 + $0x8] sm:$0xff] }
   0x2   :  { %v18_v1 = vsel %vm17_vm0, %v13_v0, -inf  ;;  %v21_v3 = vsel %vm17_vm0, %v14_v2, -inf  ;;  %v15_v48 = vld [vmem:[%s182_s0] sm:$0xff]  ;;  %v16_v58 = vld [vmem:[%s182_s0 + $0x8] sm:$0xff] }
   0x3   :  { %19 = vmax.xlane.f32.xlu0 %v18_v1  ;;  %v78_v53 = vmul.f32 0.7, %v15_v48  ;;  %v79_v63 = vmul.f32 0.7, %v16_v58 }
   0xb   :  { %22 = vmax.xlane.f32.xlu0 %v21_v3 }
  0x76   :  { %v20_v4 = vpop.xlane.xlu0 %19 }
  0x77   :  { %v24_v5 = vsub.f32 %v13_v0, %v20_v4 }
  0x79   :  { %v26_v6 = vmul.f32 1.442695, %v24_v5 }
  0x7b   :  { %111 = vpow2.f32 %v26_v6 }
  0x7e   :  { %v23_v7 = vpop.xlane.xlu0 %22 }
  0x7f   :  { %v25_v8 = vsub.f32 %v14_v2, %v23_v7 }
  0x81   :  { %v112_v9 = vpop.eup %111  ;;  %v28_v10 = vmul.f32 1.442695, %v25_v8 }
  0x82   :  { %v30_v11 = vsel %vm17_vm0, %v112_v9, 0.0 }
  0x83   :  { %113 = vpow2.f32 %v28_v10  ;;  %31 = vadd.xlane.f32.xlu1 %v30_v11 }
  0x89   :  { %v114_v12 = vpop.eup %113 }
  0x8a   :  { %v33_v13 = vsel %vm17_vm0, %v114_v12, 0.0 }
  0x8b   :  { %34 = vadd.xlane.f32.xlu1 %v33_v13 }
  0xf6   :  { %v32_v14 = vpop.xlane.xlu1 %31 }
  0xf7   :  { %115 = vrcp.f32 %v32_v14 }
  0xfd   :  { %v116_v15 = vpop.eup %115 }
  0xfe   :  { %v38_v16 = vmul.f32 %v116_v15, %v32_v14  ;;  %v35_v17 = vpop.xlane.xlu1 %34 }
  0xff   :  { %117 = vrcp.f32 %v35_v17 }
 0x100   :  { %v40_v18 = vsub.f32 2.0, %v38_v16 }
 0x102   :  { %v42_v19 = vmul.f32 %v116_v15, %v40_v18 }
 0x104   :  { %v44_v20 = vmul.f32 %v42_v19, %v32_v14 }
 0x105   :  { %v118_v21 = vpop.eup %117 }
 0x106   :  { %v46_v22 = vsub.f32 2.0, %v44_v20  ;;  %v39_v23 = vmul.f32 %v118_v21, %v35_v17 }
 0x108   :  { %v48_v24 = vmul.f32 %v46_v22, %v42_v19  ;;  %v41_v25 = vsub.f32 2.0, %v39_v23 }
 0x10a   :  { %v43_v26 = vmul.f32 %v118_v21, %v41_v25  ;;  %v50_v27 = vmul.f32 %v112_v9, %v48_v24 }
 0x10c   :  { %v45_v28 = vmul.f32 %v43_v26, %v35_v17  ;;  %v52_v29 = vmax.f32 %v50_v27, 0.0001 }
 0x10e   :  { %v47_v30 = vsub.f32 2.0, %v45_v28  ;;  %v54_v31 = vmin.f32 %v52_v29, 0.9999 }
 0x110   :  { %v49_v32 = vmul.f32 %v47_v30, %v43_v26  ;;  %v56_v33 = vsel %vm17_vm0, %v54_v31, 0.0 }
 0x111   :  { %57 = vadd.xlane.f32.xlu2 %v56_v33 }
 0x112   :  { %v51_v34 = vmul.f32 %v114_v12, %v49_v32 }
 0x114   :  { %v53_v35 = vmax.f32 %v51_v34, 0.0001 }
 0x116   :  { %v55_v36 = vmin.f32 %v53_v35, 0.9999 }
 0x118   :  { %v59_v37 = vsel %vm17_vm0, %v55_v36, 0.0 }
 0x119   :  { %60 = vadd.xlane.f32.xlu2 %v59_v37 }
 0x184   :  { %v58_v38 = vpop.xlane.xlu2 %57 }
 0x185   :  { %119 = vrcp.f32 %v58_v38 }
 0x18b   :  { %v120_v39 = vpop.eup %119 }
 0x18c   :  { %v64_v40 = vmul.f32 %v120_v39, %v58_v38  ;;  %v61_v41 = vpop.xlane.xlu2 %60 }
 0x18d   :  { %121 = vrcp.f32 %v61_v41 }
 0x18e   :  { %v66_v42 = vsub.f32 2.0, %v64_v40 }
 0x190   :  { %v68_v43 = vmul.f32 %v120_v39, %v66_v42 }
 0x192   :  { %v70_v44 = vmul.f32 %v68_v43, %v58_v38 }
 0x193   :  { %v122_v45 = vpop.eup %121 }
 0x194   :  { %v72_v46 = vsub.f32 2.0, %v70_v44  ;;  %v65_v47 = vmul.f32 %v122_v45, %v61_v41 }
 0x196   :  { %v74_v49 = vmul.f32 %v72_v46, %v68_v43  ;;  %v67_v50 = vsub.f32 2.0, %v65_v47 }
 0x198   :  { %v69_v51 = vmul.f32 %v122_v45, %v67_v50  ;;  %v76_v52 = vmul.f32 %v74_v49, %v54_v31 }
 0x19a   :  { %v71_v54 = vmul.f32 %v69_v51, %v61_v41  ;;  %v80_v55 = vmul.f32 0.3, %v76_v52 }
 0x19c   :  { %v73_v56 = vsub.f32 2.0, %v71_v54  ;;  %v82_v57 = vadd.f32 %v80_v55, %v78_v53 }
 0x19e   :  { %v75_v59 = vmul.f32 %v73_v56, %v69_v51  ;;  %v86_v60 = vmul.f32 %v82_v57, %v54_v31  ;;  %84 = vst.msk [vmem:[%s183_s2] sm:$0xff] %vm17_vm0, %v82_v57 }
 0x1a0   :  { %v77_v61 = vmul.f32 %v75_v59, %v55_v36  ;;  %v88_v62 = vsel %vm17_vm0, %v86_v60, 0.0 }
 0x1a1   :  { %89 = vadd.xlane.f32.xlu0 %v88_v62 }
 0x1a2   :  { %v81_v0 = vmul.f32 0.3, %v77_v61 }
 0x1a4   :  { %v83_v1 = vadd.f32 %v81_v0, %v79_v63 }
 0x1a6   :  { %v87_v2 = vmul.f32 %v83_v1, %v55_v36  ;;  %85 = vst.msk [vmem:[%s183_s2 + $0x8] sm:$0xff] %vm17_vm0, %v83_v1 }
 0x1a8   :  { %v91_v3 = vsel %vm17_vm0, %v87_v2, 0.0 }
 0x1a9   :  { %92 = vadd.xlane.f32.xlu1 %v91_v3 }
 0x214   :  { %v90_v4 = vpop.xlane.xlu0 %89 }
 0x215   :  { %v94_v5 = vsub.f32 1.0, %v90_v4 }
 0x217   :  { %123 = vlog2.f32 %v94_v5 }
 0x21c   :  { %v93_v6 = vpop.xlane.xlu1 %92 }
 0x21d   :  { %v124_v7 = vpop.eup %123  ;;  %v95_v8 = vsub.f32 1.0, %v93_v6 }
 0x21e   :  { %v97_v9 = vmul.f32 0.6931472, %v124_v7 }
 0x21f   :  { %125 = vlog2.f32 %v95_v8 }
 0x220   :  { %101 = vst.msk [vmem:[%s184_s3] sm:$0xff] %vm100_vm1, %v97_v9 }
 0x225   :  { %v126_v10 = vpop.eup %125 }
 0x226   :  { %v99_v11 = vmul.f32 0.6931472, %v126_v10 }
 0x228   :  { %102 = vst.msk [vmem:[%s184_s3 + $0x8] sm:$0xff] %vm100_vm1, %v99_v11 }

</bundles_post_ra>
